<compile_context>
chip_gen: v5e
topology: v5e:2x2
jax: 0.10.0
libtpu: 0.0.40
codegen_flags: <defaults>
</compile_context>

<pallas_src>
import jax
import jax.numpy as jnp
from jax.experimental import pallas as pl
from jax.experimental.pallas import tpu as pltpu

IN_FEATURES = 28 * 28          # 784
OUT_FEATURES = 10
K_PAD = 896                    # 7 * 128, lane-aligned contraction dim
N_PAD = 128                    # lane-dense output slab
NEG_LARGE = -1e30              # exp(NEG_LARGE) == 0.0 in f32 -> padded logits vanish


def _round_up(n, m):
    return ((n + m - 1) // m) * m


def _fc_softmax_kernel(x_ref, w_ref, b_ref, o_ref):
    # Linear: z = x @ W.T + b  (w_ref holds W.T zero-padded to (896, 128)).
    # Matmul inputs may be bf16; accumulation is f32 on the MXU.
    z = jnp.dot(x_ref[...], w_ref[...], preferred_element_type=jnp.float32)
    z = z + b_ref[...]                          # padded lanes get -1e30
    # Custom Softmax from the PyTorch module: exp(z) / exp(z).sum(dim=1)
    # (no max-subtraction, reproduced exactly; all post-matmul math in f32).
    e = jnp.exp(z)                              # padded lanes -> exactly 0
    denom = jnp.sum(e, axis=1, keepdims=True)   # sums only the 10 real columns
    o_ref[...] = (e * pl.reciprocal(denom, approx=True)).astype(o_ref.dtype)


def neural_net_forward(x, weight, bias, *, compute_dtype=jnp.bfloat16,
                       batch_tile=2048):
    """x: any shape with prod(shape[1:]) == 784 (e.g. NCHW (B,1,28,28)).
    weight: (10, 784) like nn.Linear.weight; bias: (10,)."""
    B = x.shape[0]
    x_flat = x.reshape(B, IN_FEATURES)

    # Batch tile: multiple of 8, capped at 2048 (~3.5 MiB bf16/tile) so the
    # double-buffered pipeline fits v7x's smaller VMEM as well as v5e/v6e.
    TB = _round_up(min(batch_tile, _round_up(B, 8)), 8)
    B_pad = _round_up(B, TB)

    # Zero-pad batch rows and K; pad N to 128.  Padded rows are all-zero so
    # they produce finite (ignored) softmax rows that we slice off below.
    x_pad = jnp.zeros((B_pad, K_PAD), dtype=compute_dtype)
    x_pad = x_pad.at[:B, :IN_FEATURES].set(x_flat.astype(compute_dtype))
    w_pad = jnp.zeros((K_PAD, N_PAD), dtype=compute_dtype)
    w_pad = w_pad.at[:IN_FEATURES, :OUT_FEATURES].set(
        weight.T.astype(compute_dtype))
    b_pad = jnp.full((1, N_PAD), NEG_LARGE, dtype=jnp.float32)
    b_pad = b_pad.at[0, :OUT_FEATURES].set(bias.astype(jnp.float32))

    grid = (B_pad // TB,)

    itemsize = jnp.dtype(compute_dtype).itemsize
    x_tile_bytes = TB * K_PAD * itemsize
    w_bytes = K_PAD * N_PAD * itemsize
    b_bytes = 8 * N_PAD * 4
    out_tile_bytes = TB * N_PAD * 4
    vmem_needed = 2 * (x_tile_bytes + out_tile_bytes) + 2 * (w_bytes + b_bytes)
    vmem_limit = int(min(max(2 * vmem_needed, 16 << 20), 32 << 20))

    cost = pl.CostEstimate(
        flops=2 * B_pad * K_PAD * N_PAD,
        transcendentals=B_pad * N_PAD,
        bytes_accessed=(B_pad * K_PAD * itemsize + w_bytes
                        + N_PAD * 4 + B_pad * N_PAD * 4),
    )

    out = pl.pallas_call(
        _fc_softmax_kernel,
        out_shape=jax.ShapeDtypeStruct((B_pad, N_PAD), jnp.float32),
        grid=grid,
        in_specs=[
            pl.BlockSpec((TB, K_PAD), lambda i: (i, 0)),      # streamed batch tiles
            pl.BlockSpec((K_PAD, N_PAD), lambda i: (0, 0)),   # VMEM-resident weight
            pl.BlockSpec((1, N_PAD), lambda i: (0, 0)),       # VMEM-resident bias
        ],
        out_specs=pl.BlockSpec((TB, N_PAD), lambda i: (i, 0)),
        compiler_params=pltpu.CompilerParams(
            dimension_semantics=("parallel",),
            vmem_limit_bytes=vmem_limit,
        ),
        cost_estimate=cost,
    )(x_pad, w_pad, b_pad)

    return out[:B, :OUT_FEATURES]


def init_params(key):
    # nn.init.xavier_uniform_ on fc.weight (shape (10, 784)):
    # uniform(-a, a) with a = sqrt(6 / (fan_in + fan_out)); zero bias.
    a = (6.0 / (IN_FEATURES + OUT_FEATURES)) ** 0.5
    weight = jax.random.uniform(
        key, (OUT_FEATURES, IN_FEATURES), dtype=jnp.float32, minval=-a, maxval=a
    )
    bias = jnp.zeros((OUT_FEATURES,), dtype=jnp.float32)
    return weight, bias


def _reference(x, weight, bias):
    xf = x.reshape(x.shape[0], IN_FEATURES).astype(jnp.float32)
    z = xf @ weight.T.astype(jnp.float32) + bias.astype(jnp.float32)
    e = jnp.exp(z)
    return e / jnp.sum(e, axis=1, keepdims=True)


if __name__ == "__main__":
    key = jax.random.PRNGKey(0)
    k_w, k_x = jax.random.split(key)
    weight, bias = init_params(k_w)

    # Small MNIST-like input: batch=2, NCHW (2, 1, 28, 28)
    x = jax.random.normal(k_x, (2, 1, 28, 28), dtype=jnp.float32)

    out = neural_net_forward(x, weight, bias)
    out = jax.block_until_ready(out)

    assert out.shape == (2, OUT_FEATURES)
    # Sanity: softmax rows sum to 1 (approx reciprocal + bf16 matmul -> loose tol)
    row_sums = jnp.sum(out, axis=1)
    assert bool(jnp.all(jnp.abs(row_sums - 1.0) < 1e-2)), row_sums
    # Match the pure-f32 reference forward pass (bf16 activations -> loose tol)
    ref = _reference(x, weight, bias)
    assert bool(jnp.max(jnp.abs(out - ref)) < 3e-2), jnp.max(jnp.abs(out - ref))

    print("KERNEL_OK")
</pallas_src>

<mosaic_0001>
module attributes {stable_mosaic.version = 11 : i64} {
  func.func @_fc_softmax_kernel(%arg0: i32, %arg1: memref<8x896xbf16, #tpu.memory_space<vmem>>, %arg2: memref<896x128xbf16, #tpu.memory_space<vmem>>, %arg3: memref<1x128xf32, #tpu.memory_space<vmem>>, %arg4: memref<8x128xf32, #tpu.memory_space<vmem>>) attributes {dimension_semantics = [#tpu.dimension_semantics<parallel>], iteration_bounds = array<i64: 1>, scalar_prefetch = 0 : i64, scratch_operands = 0 : i64, tpu.core_type = #tpu.core_type<tc>, window_params = [{transform_indices = @transform_0, window_bounds = array<i64: 8, 896>}, {pipeline_mode = #tpu.pipeline_mode<synchronous>, transform_indices = @transform_1, window_bounds = array<i64: 896, 128>}, {pipeline_mode = #tpu.pipeline_mode<synchronous>, transform_indices = @transform_2, window_bounds = array<i64: 1, 128>}, {transform_indices = @transform_3, window_bounds = array<i64: 8, 128>}]} {
    %c0 = arith.constant 0 : index
    %c0_0 = arith.constant 0 : index
    %0 = vector.load %arg1[%c0, %c0_0] : memref<8x896xbf16, #tpu.memory_space<vmem>>, vector<8x896xbf16>
    %c0_1 = arith.constant 0 : index
    %c0_2 = arith.constant 0 : index
    %1 = vector.load %arg2[%c0_1, %c0_2] : memref<896x128xbf16, #tpu.memory_space<vmem>>, vector<896x128xbf16>
    %cst = arith.constant dense<0.000000e+00> : vector<8x128xf32>
    %2 = tpu.matmul %0, %1, %cst {dimension_numbers = #tpu.dot_dimension_numbers<[1], [0], [0], [1], [0, 0, 1, 1], [], []>} : vector<8x896xbf16>, vector<896x128xbf16>, vector<8x128xf32> -> vector<8x128xf32>
    %c0_3 = arith.constant 0 : index
    %c0_4 = arith.constant 0 : index
    %3 = vector.load %arg3[%c0_3, %c0_4] : memref<1x128xf32, #tpu.memory_space<vmem>>, vector<1x128xf32>
    %4 = vector.broadcast %3 : vector<1x128xf32> to vector<8x128xf32>
    %5 = arith.addf %2, %4 : vector<8x128xf32>
    %6 = math.exp %5 : vector<8x128xf32>
    %cst_5 = arith.constant dense<0.000000e+00> : vector<8xf32>
    %7 = vector.multi_reduction <add>, %6, %cst_5 [1] : vector<8x128xf32> to vector<8xf32>
    %8 = vector.shape_cast %7 : vector<8xf32> to vector<8x1xf32>
    %9 = tpu.reciprocal %8 {approx = true} : vector<8x1xf32> -> vector<8x1xf32>
    %10 = vector.broadcast %9 : vector<8x1xf32> to vector<8x128xf32>
    %11 = arith.mulf %6, %10 : vector<8x128xf32>
    %c0_6 = arith.constant 0 : index
    %c0_7 = arith.constant 0 : index
    %12 = vector.load %arg4[%c0_6, %c0_7] : memref<8x128xf32, #tpu.memory_space<vmem>>, vector<8x128xf32>
    tpu.vector_store %arg4[%c0_6, %c0_7], %11 {strides = array<i32>} : memref<8x128xf32, #tpu.memory_space<vmem>>, vector<8x128xf32>,
    return
  }
  func.func @transform_0(%arg0: i32) -> (i32, i32) {
    %c0_i32 = arith.constant 0 : i32
    %c0_i32_0 = arith.constant 0 : i32
    return %arg0, %c0_i32 : i32, i32
  }
  func.func @transform_1(%arg0: i32) -> (i32, i32) {
    %c0_i32 = arith.constant 0 : i32
    %c0_i32_0 = arith.constant 0 : i32
    %c0_i32_1 = arith.constant 0 : i32
    return %c0_i32, %c0_i32_0 : i32, i32
  }
  func.func @transform_2(%arg0: i32) -> (i32, i32) {
    %c0_i32 = arith.constant 0 : i32
    %c0_i32_0 = arith.constant 0 : i32
    %c0_i32_1 = arith.constant 0 : i32
    return %c0_i32, %c0_i32_0 : i32, i32
  }
  func.func @transform_3(%arg0: i32) -> (i32, i32) {
    %c0_i32 = arith.constant 0 : i32
    %c0_i32_0 = arith.constant 0 : i32
    return %arg0, %c0_i32 : i32, i32
  }
}

</mosaic_0001>

<bundles_post_ra>
// kernel: tpu_custom_call.1
= control target key start
LH: loop header
LB: loop body
LE: loop exit
PB: predicated region body
PF: predicated region fallthrough
CT: control target
= control target key end

     0   :  { %8 = vsyncpa [#allocation3], 0  ;;  %s1047_s0 = inlined_call_operand.hbm [shape: bf16[8,896], index: 0, kind: input, shape index: {}]   ;;  %s1048_s1 = inlined_call_operand.hbm [shape: bf16[896,128], index: 1, kind: input, shape index: {}]   ;;  %s1049_s2 = inlined_call_operand.vmem [shape: f32[1,128], index: 2, kind: input, shape index: {}]   ;;  %s1050_s3 = inlined_call_operand.hbm [shape: f32[8,128], index: 3, kind: output, shape index: {}]  }
   0x1   :  { %9 = vsyncpa [#allocation6], 0 }
   0x2   :  { %10 = vsyncpa [#allocation4], 0  ;;  %s16_s14 = sshll.u32 %s1047_s0, 4  ;;  %s1010_s15 = smov [#allocation2]   ;;  %s17_s14 = int_to_ptr.hbm [resolvable:$true] %s16_s14 }
   0x3   :  { %s18_s16 = sshll.u32 %s1010_s15, 4  ;;  %s26_s19 = sshll.u32 %s1048_s1, 4  ;;  %s19_s16 = int_to_ptr.vmem [resolvable:$true] %s18_s16  ;;  %s27_s19 = int_to_ptr.hbm [resolvable:$true] %s26_s19 }
   0x4   :  { %21 = dma.hbm_to_vmem [thread:$0]  %s17_s14, 448, %s19_s16, [#allocation3]  }
   0x5   :  { %s1011_s20 = smov [#allocation5]   ;;  %s1012_s22 = smov 64  }
   0x6   :  { %s28_s21 = sshll.u32 %s1011_s20, 4  ;;  %s1013_s23 = smov 4   ;;  %s29_s21 = int_to_ptr.vmem [resolvable:$true] %s28_s21 }
   0x7   :  { %34 = dma.hbm_to_vmem [thread:$0]  %s27_s19, 7168, %s29_s21, [#allocation6], %s1012_s22, %s1012_s22, %s1013_s23  }
   0x8   :  { %1004 = dma.done.wait [#allocation3], 448  }
   0x9   :  { %1005 = vsyncadd [#allocation3], 4294966848 }
   0xa   :  { %1006 = dma.done.wait [#allocation6], 7168  }
   0xb   :  { %1007 = vsyncadd [#allocation6], 4294960128  ;;  %v873_v0 = vld [vmem:[#allocation5 + $0x38] sm:$0xff]  ;;  %v872_v3 = vld [vmem:[#allocation5 + $0x30] sm:$0xff]  ;;  %s631_s27 = sshll.u32 %s1050_s3, 4  ;;  %s632_s27 = int_to_ptr.hbm [resolvable:$true] %s631_s27 }
   0xc   :  { %v881_v1 = vld [vmem:[#allocation5 + $0x78] sm:$0xff]  ;;  %526 = vmatpush.bf16.msra.mxu0 %v873_v0  ;;  %v880_v4 = vld [vmem:[#allocation5 + $0x70] sm:$0xff]  ;;  %v871_v7 = vld [vmem:[#allocation5 + $0x28] sm:$0xff] }
   0xd   :  { %v889_v2 = vld [vmem:[#allocation5 + $0xb8] sm:$0xff]  ;;  %539 = vmatpush.bf16.msra.mxu1 %v881_v1  ;;  %v888_v5 = vld [vmem:[#allocation5 + $0xb0] sm:$0xff]  ;;  %v879_v8 = vld [vmem:[#allocation5 + $0x68] sm:$0xff] }
   0xe   :  { %552 = vmatpush.bf16.msra.mxu2 %v889_v2  ;;  %v897_v6 = vld [vmem:[#allocation5 + $0xf8] sm:$0xff]  ;;  %v887_v9 = vld [vmem:[#allocation5 + $0xa8] sm:$0xff]  ;;  %v896_v10 = vld [vmem:[#allocation5 + $0xf0] sm:$0xff] }
   0xf   :  { %565 = vmatpush.bf16.msra.mxu3 %v897_v6  ;;  %v870_v11 = vld [vmem:[#allocation5 + $0x20] sm:$0xff]  ;;  %v895_v14 = vld [vmem:[#allocation5 + $0xe8] sm:$0xff]  ;;  %v869_v15 = vld [vmem:[#allocation5 + $0x18] sm:$0xff] }
  0x10   :  { %527 = vmatpush.bf16.msra.mxu0 %v872_v3  ;;  %v878_v12 = vld [vmem:[#allocation5 + $0x60] sm:$0xff]  ;;  %v877_v16 = vld [vmem:[#allocation5 + $0x58] sm:$0xff]  ;;  %v868_v19 = vld [vmem:[#allocation5 + $0x10] sm:$0xff] }
  0x11   :  { %540 = vmatpush.bf16.msra.mxu1 %v880_v4  ;;  %v886_v13 = vld [vmem:[#allocation5 + $0xa0] sm:$0xff]  ;;  %v885_v17 = vld [vmem:[#allocation5 + $0x98] sm:$0xff]  ;;  %v876_v20 = vld [vmem:[#allocation5 + $0x50] sm:$0xff] }
  0x12   :  { %553 = vmatpush.bf16.msra.mxu2 %v888_v5  ;;  %v894_v18 = vld [vmem:[#allocation5 + $0xe0] sm:$0xff]  ;;  %v884_v21 = vld [vmem:[#allocation5 + $0x90] sm:$0xff]  ;;  %v893_v22 = vld [vmem:[#allocation5 + $0xd8] sm:$0xff] }
  0x13   :  { %566 = vmatpush.bf16.msra.mxu3 %v896_v10  ;;  %v867_v23 = vld [vmem:[#allocation5 + $0x8] sm:$0xff]  ;;  %v892_v27 = vld [vmem:[#allocation5 + $0xd0] sm:$0xff]  ;;  %v866_v30 = vld [vmem:[#allocation5] sm:$0xff] }
  0x14   :  { %528 = vmatpush.bf16.msra.mxu0 %v871_v7  ;;  %v875_v24 = vld [vmem:[#allocation5 + $0x48] sm:$0xff]  ;;  %v874_v31 = vld [vmem:[#allocation5 + $0x40] sm:$0xff]  ;;  %v905_v35 = vld [vmem:[#allocation5 + $0x138] sm:$0xff] }
  0x15   :  { %541 = vmatpush.bf16.msra.mxu1 %v879_v8  ;;  %v45_v25 = vld [vmem:[#allocation2] sm:$0xff]  ;;  %v46_v28 = vld [vmem:[#allocation2 + $0x8] sm:$0xff]  ;;  %v913_v36 = vld [vmem:[#allocation5 + $0x178] sm:$0xff] }
  0x16   :  { %554 = vmatpush.bf16.msra.mxu2 %v887_v9  ;;  %v883_v26 = vld [vmem:[#allocation5 + $0x88] sm:$0xff]  ;;  %v169_v29 = vunpack.c.l.b16 %v45_v25  ;;  %v171_v32 = vunpack.c.l.b16 %v46_v28  ;;  %v170_v33 = vunpack.c.h.b16 %v45_v25  ;;  %v882_v34 = vld [vmem:[#allocation5 + $0x80] sm:$0xff]  ;;  %v921_v37 = vld [vmem:[#allocation5 + $0x1b8] sm:$0xff]  ;;  %v172_v46 = vunpack.c.h.b16 %v46_v28 }
  0x17   :  { %567 = vmatpush.bf16.msra.mxu3 %v895_v14  ;;  %v891_v39 = vld [vmem:[#allocation5 + $0xc8] sm:$0xff]  ;;  %v904_v42 = vld [vmem:[#allocation5 + $0x130] sm:$0xff]  ;;  %v890_v45 = vld [vmem:[#allocation5 + $0xc0] sm:$0xff] }
  0x18   :  { %529 = vmatpush.bf16.msra.mxu0 %v870_v11  ;;  %v176_v38 = vpack.c.b16 %v169_v29, %v169_v29  ;;  %v178_v40 = vpack.c.b16 %v171_v32, %v171_v32  ;;  %v177_v41 = vpack.c.b16 %v170_v33, %v170_v33  ;;  %v912_v43 = vld [vmem:[#allocation5 + $0x170] sm:$0xff]  ;;  %v903_v47 = vld [vmem:[#allocation5 + $0x128] sm:$0xff]  ;;  %v179_v50 = vpack.c.b16 %v172_v46, %v172_v46  ;;  %v902_v51 = vld [vmem:[#allocation5 + $0x120] sm:$0xff] }
  0x19   :  { %542 = vmatpush.bf16.msra.mxu1 %v878_v12  ;;  %v920_v44 = vld [vmem:[#allocation5 + $0x1b0] sm:$0xff]  ;;  %v911_v48 = vld [vmem:[#allocation5 + $0x168] sm:$0xff]  ;;  %v910_v52 = vld [vmem:[#allocation5 + $0x160] sm:$0xff] }
  0x1a   :  { %555 = vmatpush.bf16.msra.mxu2 %v886_v13  ;;  %v919_v49 = vld [vmem:[#allocation5 + $0x1a8] sm:$0xff]  ;;  %v918_v53 = vld [vmem:[#allocation5 + $0x1a0] sm:$0xff]  ;;  %v901_v54 = vld [vmem:[#allocation5 + $0x118] sm:$0xff] }
  0x1b   :  { %568 = vmatpush.bf16.msra.mxu3 %v894_v18  ;;  %v909_v55 = vld [vmem:[#allocation5 + $0x158] sm:$0xff]  ;;  %v900_v57 = vld [vmem:[#allocation5 + $0x110] sm:$0xff]  ;;  %v899_v60 = vld [vmem:[#allocation5 + $0x108] sm:$0xff] }
  0x1c   :  { %530 = vmatpush.bf16.msra.mxu0 %v869_v15  ;;  %v917_v56 = vld [vmem:[#allocation5 + $0x198] sm:$0xff]  ;;  %v908_v58 = vld [vmem:[#allocation5 + $0x150] sm:$0xff]  ;;  %v907_v62 = vld [vmem:[#allocation5 + $0x148] sm:$0xff] }
  0x1d   :  { %543 = vmatpush.bf16.msra.mxu1 %v877_v16  ;;  %v916_v59 = vld [vmem:[#allocation5 + $0x190] sm:$0xff]  ;;  %v915_v63 = vld [vmem:[#allocation5 + $0x188] sm:$0xff]  ;;  %v48_v0 = vld [vmem:[#allocation2 + $0x18] sm:$0xf] }
  0x1e   :  { %556 = vmatpush.bf16.msra.mxu2 %v885_v17  ;;  %v47_v61 = vld [vmem:[#allocation2 + $0x10] sm:$0xff]  ;;  %v898_v2 = vld [vmem:[#allocation5 + $0x100] sm:$0xff]  ;;  %v175_v4 = vunpack.c.l.b16 %v48_v0 }
  0x1f   :  { %569 = vmatpush.bf16.msra.mxu3 %v893_v22  ;;  %v173_v1 = vunpack.c.l.b16 %v47_v61  ;;  %v174_v3 = vunpack.c.h.b16 %v47_v61  ;;  %v906_v5 = vld [vmem:[#allocation5 + $0x140] sm:$0xff] }
  0x20   :  { %531 = vmatpush.bf16.msra.mxu0 %v868_v19  ;;  %v914_v6 = vld [vmem:[#allocation5 + $0x180] sm:$0xff]  ;;  %v182_v9 = vpack.c.b16 %v175_v4, %v175_v4 }
  0x21   :  { %544 = vmatpush.bf16.msra.mxu1 %v876_v20  ;;  %v180_v7 = vpack.c.b16 %v173_v1, %v173_v1  ;;  %v181_v8 = vpack.c.b16 %v174_v3, %v174_v3  ;;  %v927_v15 = vld [vmem:[%s1049_s2] ss:$0 sm:$0xff]  ;;  %s1014_s2 = smov [#allocation7]  }
  0x22   :  { %557 = vmatpush.bf16.msra.mxu2 %v884_v21  ;;  %s629_s24 = sshll.u32 %s1014_s2, 4  ;;  %s630_s24 = int_to_ptr.vmem [resolvable:$true] %s629_s24 }
  0x23   :  { %570 = vmatpush.bf16.msra.mxu3 %v892_v27 }
  0x24   :  { %532 = vmatpush.bf16.msra.mxu0 %v867_v23 }
  0x25   :  { %545 = vmatpush.bf16.msra.mxu1 %v875_v24 }
  0x26   :  { %558 = vmatpush.bf16.msra.mxu2 %v883_v26 }
  0x27   :  { %571 = vmatpush.bf16.msra.mxu3 %v891_v39 }
  0x28   :  { %533 = vmatpush.bf16.msra.mxu0 %v866_v30 }
  0x29   :  { %546 = vmatpush.bf16.msra.mxu1 %v874_v31 }
  0x2a   :  { %559 = vmatpush.bf16.msra.mxu2 %v882_v34 }
  0x2b   :  { %534 = vmatmul.bf16.vlgmr.msra.gmra.mxu0 %v176_v38  ;;  %572 = vmatpush.bf16.msra.mxu3 %v890_v45 }
  0x2c   :  { %578 = vmatpush.bf16.msrb.mxu0 %v905_v35  ;;  %547 = vmatmul.bf16.vlgmr.msra.gmra.mxu1 %v177_v41 }
  0x2d   :  { %591 = vmatpush.bf16.msrb.mxu1 %v913_v36  ;;  %560 = vmatmul.bf16.vlgmr.msra.gmra.mxu2 %v178_v40 }
  0x2e   :  { %604 = vmatpush.bf16.msrb.mxu2 %v921_v37  ;;  %573 = vmatmul.bf16.vlgmr.msra.gmra.mxu3 %v179_v50 }
  0x30   :  { %579 = vmatpush.bf16.msrb.mxu0 %v904_v42 }
  0x31   :  { %592 = vmatpush.bf16.msrb.mxu1 %v912_v43 }
  0x32   :  { %605 = vmatpush.bf16.msrb.mxu2 %v920_v44 }
  0x34   :  { %580 = vmatpush.bf16.msrb.mxu0 %v903_v47 }
  0x35   :  { %593 = vmatpush.bf16.msrb.mxu1 %v911_v48 }
  0x36   :  { %606 = vmatpush.bf16.msrb.mxu2 %v919_v49 }
  0x38   :  { %581 = vmatpush.bf16.msrb.mxu0 %v902_v51 }
  0x39   :  { %594 = vmatpush.bf16.msrb.mxu1 %v910_v52 }
  0x3a   :  { %607 = vmatpush.bf16.msrb.mxu2 %v918_v53 }
  0x3c   :  { %582 = vmatpush.bf16.msrb.mxu0 %v901_v54 }
  0x3d   :  { %595 = vmatpush.bf16.msrb.mxu1 %v909_v55 }
  0x3e   :  { %608 = vmatpush.bf16.msrb.mxu2 %v917_v56 }
  0x40   :  { %583 = vmatpush.bf16.msrb.mxu0 %v900_v57 }
  0x41   :  { %596 = vmatpush.bf16.msrb.mxu1 %v908_v58 }
  0x42   :  { %609 = vmatpush.bf16.msrb.mxu2 %v916_v59 }
  0x44   :  { %584 = vmatpush.bf16.msrb.mxu0 %v899_v60 }
  0x45   :  { %597 = vmatpush.bf16.msrb.mxu1 %v907_v62 }
  0x46   :  { %610 = vmatpush.bf16.msrb.mxu2 %v915_v63 }
  0x48   :  { %585 = vmatpush.bf16.msrb.mxu0 %v898_v2 }
  0x49   :  { %598 = vmatpush.bf16.msrb.mxu1 %v906_v5 }
  0x4a   :  { %611 = vmatpush.bf16.msrb.mxu2 %v914_v6 }
  0x4b   :  { %586 = vmatmul.bf16.vlgmr.msrb.gmra.mxu0 %v180_v7 }
  0x4c   :  { %599 = vmatmul.bf16.vlgmr.msrb.gmra.mxu1 %v181_v8 }
  0x4d   :  { %612 = vmatmul.bf16.vlgmr.msrb.gmra.mxu2 %v182_v9 }
  0xa8   :  { %v535_v10 = vpop.f32.mrf.mxu0 }
  0xa9   :  { %v548_v11 = vpop.f32.mrf.mxu1  ;;  %v536_v18 = vadd.f32 %v927_v15, %v535_v10 }
  0xab   :  { %v549_v19 = vadd.f32 %v548_v11, %v536_v18 }
  0xb0   :  { %v561_v12 = vpop.f32.mrf.mxu2  ;;  %v537_v13 = vpop.f32.mrf.mxu0 }
  0xb1   :  { %v550_v14 = vpop.f32.mrf.mxu1  ;;  %v574_v16 = vpop.f32.mrf.mxu3  ;;  %v562_v21 = vadd.f32 %v561_v12, %v549_v19 }
  0xb3   :  { %v575_v22 = vadd.f32 %v574_v16, %v562_v21 }
  0xb8   :  { %v563_v17 = vpop.f32.mrf.mxu2 }
  0xb9   :  { %v576_v20 = vpop.f32.mrf.mxu3 }
  0xc8   :  { %v587_v23 = vpop.f32.mrf.mxu0 }
  0xc9   :  { %v600_v24 = vpop.f32.mrf.mxu1  ;;  %v588_v25 = vadd.f32 %v587_v23, %v575_v22 }
  0xcb   :  { %v601_v26 = vadd.f32 %v600_v24, %v588_v25 }
  0xd0   :  { %v613_v27 = vpop.f32.mrf.mxu2  ;;  %v589_v29 = vpop.f32.mrf.mxu0 }
  0xd1   :  { %v614_v28 = vadd.f32 %v613_v27, %v601_v26  ;;  %v602_v30 = vpop.f32.mrf.mxu1 }
  0xd3   :  { %v617_v31 = vmul.f32 1.442695, %v614_v28 }
  0xd5   :  { %928 = vpow2.f32 %v617_v31 }
  0xd8   :  { %v615_v32 = vpop.f32.mrf.mxu2 }
  0xdb   :  { %v929_v33 = vpop.eup %928 }
  0xdc   :  { %619 = vadd.xlane.f32.xlu0 %v929_v33 }
 0x14f   :  { %v620_v34 = vpop.xlane.xlu0 %619 }
 0x150   :  { %930 = vrcp.f32 %v620_v34 }
 0x156   :  { %v931_v35 = vpop.eup %930 }
 0x157   :  { %v622_v36 = vmul.f32 %v931_v35, %v929_v33 }
 0x159   :  { %623 = vst [vmem:[#allocation7] sm:$0xff] %v622_v36 }
 0x15a   :  { %634 = dma.vmem_to_hbm [thread:$0]  %s630_s24, 128, %s632_s27, [#allocation4]  }
 0x15b   :  { %1008 = dma.done.wait [#allocation4], 128  }
 0x15c   :  { %1009 = vsyncadd [#allocation4], 4294967168 }
 0x15d   :  { %639 = vsyncpa [#allocation3], 1 }
 0x15e   :  { %640 = vsyncpa [#allocation6], 1 }
 0x15f   :  { %641 = vsyncpa [#allocation4], 1 }

</bundles_post_ra>
